<compile_context>
chip_gen: v7x
topology: tpu7x:2x2x1
jax: 0.10.0
libtpu: 0.0.40
codegen_flags: <defaults>
</compile_context>

<pallas_src>
import math

import numpy as np

import jax
import jax.numpy as jnp
from jax.experimental import pallas as pl
from jax.experimental.pallas import tpu as pltpu


# ----------------------------------------------------------------------------
# Kernels
# ----------------------------------------------------------------------------
def _make_kernel(has_bias: bool, multi_k: bool):
    """Build the grouped-matmul kernel body.

    Refs (in order): tile_group (SMEM prefetch), x tile (tm,tk),
    W[g] tile (1,tk,tn), [bias[g] tile (1,1,tn)], out tile (tm,tn),
    [f32 acc scratch (tm,tn) when multi_k].
    """
    if multi_k:
        if has_bias:
            def kernel(tg_ref, x_ref, w_ref, b_ref, o_ref, acc_ref):
                del tg_ref  # only consumed by the index_maps
                k = pl.program_id(2)

                @pl.when(k == 0)
                def _init():
                    acc_ref[...] = jnp.zeros_like(acc_ref)

                acc_ref[...] += jnp.dot(
                    x_ref[...], w_ref[0], preferred_element_type=jnp.float32)

                @pl.when(k == pl.num_programs(2) - 1)
                def _fin():
                    o_ref[...] = (acc_ref[...]
                                  + b_ref[0].astype(jnp.float32)
                                  ).astype(o_ref.dtype)
        else:
            def kernel(tg_ref, x_ref, w_ref, o_ref, acc_ref):
                del tg_ref
                k = pl.program_id(2)

                @pl.when(k == 0)
                def _init():
                    acc_ref[...] = jnp.zeros_like(acc_ref)

                acc_ref[...] += jnp.dot(
                    x_ref[...], w_ref[0], preferred_element_type=jnp.float32)

                @pl.when(k == pl.num_programs(2) - 1)
                def _fin():
                    o_ref[...] = acc_ref[...].astype(o_ref.dtype)
    else:
        if has_bias:
            def kernel(tg_ref, x_ref, w_ref, b_ref, o_ref):
                del tg_ref
                acc = jnp.dot(x_ref[...], w_ref[0],
                              preferred_element_type=jnp.float32)
                o_ref[...] = (acc + b_ref[0].astype(jnp.float32)
                              ).astype(o_ref.dtype)
        else:
            def kernel(tg_ref, x_ref, w_ref, o_ref):
                del tg_ref
                o_ref[...] = jnp.dot(
                    x_ref[...], w_ref[0],
                    preferred_element_type=jnp.float32).astype(o_ref.dtype)
    return kernel


# ----------------------------------------------------------------------------
# Tiling helpers
# ----------------------------------------------------------------------------
def _pick_tile(dim, target, preferred_align=256):
    """Largest divisor of `dim` that is <= target, preferring 256-aligned
    tiles (v6e/v7x 256x256 MXU), falling back to 128 then 8.  Returns `dim`
    itself (full extent) when no aligned divisor exists."""
    dim, target = int(dim), int(target)
    if dim <= target:
        return dim
    for a in (preferred_align, 128, 8):
        if a > dim or dim % a != 0:
            continue
        t = (min(target, dim) // a) * a
        while t > 0 and dim % t != 0:
            t -= a
        if t > 0:
            return t
    return dim


def _vmem_budget_bytes():
    """~75% of physical VMEM: ~48 MiB on v7x (64 MiB), ~96 MiB on v5e/v6e."""
    cap = 64 * 1024 * 1024
    try:
        info = pltpu.get_tpu_info()
        cap = int(getattr(info, "vmem_capacity_bytes", cap))
    except Exception:
        pass
    return (3 * cap) // 4


def _shrink_to_fit(tm, tn, tk, *, in_f, out_f, m_align, xw_bytes, o_bytes,
                   has_bias, fit_bytes):
    """Shrink (tm, tn, tk) until the double-buffered working set fits VMEM."""
    def est(tm_, tn_, tk_):
        kt_ = max(1, in_f // tk_)
        v = 2 * (tm_ * tk_ + tk_ * tn_) * xw_bytes   # x + W tiles (2 buffers)
        v += 2 * tm_ * tn_ * o_bytes                 # out tile (2 buffers)
        if has_bias:
            v += 2 * tn_ * 4
        if kt_ > 1:
            v += tm_ * tn_ * 4                       # f32 accumulator scratch
        return v

    for _ in range(64):
        if est(tm, tn, tk) <= fit_bytes:
            break
        if tm > 256:
            tm = max(m_align, ((tm // 2) // m_align) * m_align)
            continue
        if tk > 256:
            new_tk = _pick_tile(in_f, max(256, tk // 2))
            if new_tk < tk:
                tk = new_tk
                continue
        if tn > 256:
            new_tn = _pick_tile(out_f, max(256, tn // 2))
            if new_tn < tn:
                tn = new_tn
                continue
        if tm > m_align:
            tm = max(m_align, ((tm // 2) // m_align) * m_align)
            continue
        break
    return tm, tn, tk


# ----------------------------------------------------------------------------
# Parameter preparation (hoisted out of the per-call path)
# ----------------------------------------------------------------------------
def prepare_params(weight, bias=None, compute_dtype=jnp.bfloat16):
    """One-time conversion of torch-layout parameters.

    weight (G, out, in)  ->  (G, in, out) in compute_dtype  (NN matmul layout)
    bias   (G, out)      ->  (G, 1, out) float32            (clean BlockSpec)
    """
    w_t = jnp.swapaxes(weight, 1, 2).astype(compute_dtype)
    if bias is None:
        return w_t, None
    g, out_f = bias.shape[0], bias.shape[-1]
    return w_t, bias.astype(jnp.float32).reshape(g, 1, out_f)


# ----------------------------------------------------------------------------
# Main entry point
# ----------------------------------------------------------------------------
def deep_gemm_grouped_linear(
    x,
    group_indices,
    weight_t,
    bias=None,
    *,
    block_m=512,
    block_n=512,
    block_k=None,            # None -> use full in_features (collapse K axis)
    compute_dtype=jnp.bfloat16,
    weight_buffers=2,        # >2 -> pl.Buffered(n) on the weight BlockSpec
):
    """Pallas grouped linear matching DeepGEMMGroupedLinear.forward (non-FP8).

    weight_t : (num_groups, in_features, out_features), ideally already in
               compute_dtype (use prepare_params()); cast on the fly otherwise.
    bias     : (num_groups, out_features) or (num_groups, 1, out_features).
    group_indices must contain values in [0, num_groups).  Output rows are in
    torch's group-concatenated (stable) order, like the reference module.
    The function is jittable (traced group_indices use a static upper bound
    on the number of M-tiles).
    """
    n_tokens, in_f = x.shape
    num_groups, w_in, out_f = weight_t.shape
    if w_in != in_f:
        raise ValueError(f"x in_features {in_f} != weight in_features {w_in}")

    out_dtype = x.dtype
    if n_tokens == 0:
        return jnp.zeros((0, out_f), dtype=out_dtype)

    has_bias = bias is not None

    # ---- tile sizes ---------------------------------------------------------
    xw_bytes = jnp.dtype(compute_dtype).itemsize
    o_bytes = jnp.dtype(out_dtype).itemsize
    m_align = 8 if xw_bytes >= 4 else (16 if xw_bytes == 2 else 32)

    tm = max(m_align, ((int(block_m) + m_align - 1) // m_align) * m_align)
    tn = _pick_tile(out_f, int(block_n))
    tk = in_f if block_k is None else _pick_tile(in_f, int(block_k))

    budget = _vmem_budget_bytes()
    tm, tn, tk = _shrink_to_fit(
        tm, tn, tk, in_f=in_f, out_f=out_f, m_align=m_align,
        xw_bytes=xw_bytes, o_bytes=o_bytes, has_bias=has_bias,
        fit_bytes=(4 * budget) // 5)
    kt = in_f // tk
    multi_k = kt > 1

    # ---- group bookkeeping (pure jnp -> jittable) ---------------------------
    gi = group_indices.astype(jnp.int32)
    try:
        gi_np = np.asarray(gi)          # concrete? -> exact tile count
        concrete = True
    except Exception:                   # traced under jit
        gi_np = None
        concrete = False

    if concrete:
        if gi_np.size and (gi_np.min() < 0 or gi_np.max() >= num_groups):
            raise ValueError("group_indices must lie in [0, num_groups)")
        counts_np = np.bincount(gi_np.astype(np.int64), minlength=num_groups)
        num_m_tiles = int(np.sum((counts_np + tm - 1) // tm))
        if num_m_tiles == 0:
            return jnp.zeros((0, out_f), dtype=out_dtype)
    else:
        # Static upper bound: each group adds at most one partial tile.
        num_m_tiles = -(-n_tokens // tm) + num_groups

    counts = jnp.bincount(gi, length=num_groups).astype(jnp.int32)
    tiles_per_group = (counts + (tm - 1)) // tm
    pad_counts = tiles_per_group * tm
    pad_offsets = jnp.cumsum(pad_counts) - pad_counts      # exclusive cumsum
    grp_start = jnp.cumsum(counts) - counts

    order = jnp.argsort(gi, stable=True)                   # torch concat order
    sorted_groups = gi[order]
    pos_in_group = jnp.arange(n_tokens, dtype=jnp.int32) - grp_start[sorted_groups]
    dest_rows = (pad_offsets[sorted_groups] + pos_in_group).astype(jnp.int32)

    tile_group = jnp.repeat(jnp.arange(num_groups, dtype=jnp.int32),
                            tiles_per_group, total_repeat_length=num_m_tiles)
    tile_group = jnp.clip(tile_group, 0, num_groups - 1).astype(jnp.int32)

    P = num_m_tiles * tm

    # ---- pack operands ------------------------------------------------------
    x_c = x.astype(compute_dtype)
    x_packed = jnp.zeros((P, in_f), dtype=compute_dtype).at[dest_rows].set(x_c[order])
    w_c = weight_t if weight_t.dtype == compute_dtype else weight_t.astype(compute_dtype)
    if has_bias:
        b_r = bias.astype(jnp.float32).reshape(num_groups, 1, out_f)

    # ---- pallas_call --------------------------------------------------------
    # Grid = (n_tiles, m_tiles, k_tiles): N outermost so the v7x dual-TC split
    # lands on N (disjoint weight columns per core) and so consecutive M-tiles
    # of the same group revisit (and skip re-DMA of) the same W[g] block.
    grid = (out_f // tn, num_m_tiles, kt)

    w_spec_kwargs = {}
    if weight_buffers and int(weight_buffers) != 2:
        w_spec_kwargs["pipeline_mode"] = pl.Buffered(int(weight_buffers))

    in_specs = [
        pl.BlockSpec((tm, tk), lambda ni, mi, ki, tg: (mi, ki)),              # x
        pl.BlockSpec((1, tk, tn), lambda ni, mi, ki, tg: (tg[mi], ki, ni),    # W[g]
                     **w_spec_kwargs),
    ]
    operands = [tile_group, x_packed, w_c]
    if has_bias:
        in_specs.append(
            pl.BlockSpec((1, 1, tn), lambda ni, mi, ki, tg: (tg[mi], 0, ni)))  # b[g]
        operands.append(b_r)

    scratch = [pltpu.VMEM((tm, tn), jnp.float32)] if multi_k else []

    out_packed = pl.pallas_call(
        _make_kernel(has_bias, multi_k),
        out_shape=jax.ShapeDtypeStruct((P, out_f), out_dtype),
        grid_spec=pltpu.PrefetchScalarGridSpec(
            num_scalar_prefetch=1,
            grid=grid,
            in_specs=in_specs,
            out_specs=pl.BlockSpec((tm, tn), lambda ni, mi, ki, tg: (mi, ni)),
            scratch_shapes=scratch,
        ),
        compiler_params=pltpu.CompilerParams(
            dimension_semantics=("parallel", "arbitrary", "arbitrary"),
            vmem_limit_bytes=budget,
        ),
    )(*operands)

    # Drop padding rows; result is already in torch's group-concatenated order.
    return out_packed[dest_rows]


# ----------------------------------------------------------------------------
# Init + reference (for the self-test)
# ----------------------------------------------------------------------------
def init_params(key, in_features, out_features, num_groups):
    """Deterministic init mirroring reset_parameters() bounds (torch layout)."""
    k_w, k_b = jax.random.split(key)
    w_bound = 1.0 / math.sqrt(out_features * in_features)
    weight = jax.random.uniform(
        k_w, (num_groups, out_features, in_features),
        minval=-w_bound, maxval=w_bound, dtype=jnp.float32)
    b_bound = 1.0 / math.sqrt(in_features)
    bias = jax.random.uniform(
        k_b, (num_groups, out_features),
        minval=-b_bound, maxval=b_bound, dtype=jnp.float32)
    return weight, bias


def reference(x, group_indices, weight, bias):
    """Plain replica of the torch fallback path (weight in (G, out, in))."""
    gi = np.asarray(group_indices)
    outs = []
    for i in range(weight.shape[0]):
        rows = np.where(gi == i)[0]
        if rows.size:
            o = x[rows] @ weight[i].T
            if bias is not None:
                o = o + bias[i]
            outs.append(o)
    if not outs:
        return jnp.zeros((0, weight.shape[1]), x.dtype)
    return jnp.concatenate(outs, axis=0)


if __name__ == "__main__":
    in_features, out_features, num_groups = 256, 256, 4
    n_tokens = 24

    key = jax.random.PRNGKey(0)
    k_param, k_x, k_g = jax.random.split(key, 3)

    weight, bias = init_params(k_param, in_features, out_features, num_groups)
    x = jax.random.normal(k_x, (n_tokens, in_features), dtype=jnp.float32)
    group_indices = jax.random.randint(
        k_g, (n_tokens,), 0, num_groups, dtype=jnp.int32)

    ref = reference(x, group_indices, weight, bias)

    # 1) Exact path: f32 compute, small tiles so the tiny demo still exercises
    #    M/N/K tiling and the K-axis accumulation kernel (block_k=128 -> kt=2).
    w_t32, b_r32 = prepare_params(weight, bias, compute_dtype=jnp.float32)
    out_f32 = deep_gemm_grouped_linear(
        x, group_indices, w_t32, b_r32,
        block_m=16, block_n=128, block_k=128, compute_dtype=jnp.float32)
    out_f32 = jax.block_until_ready(out_f32)
    assert out_f32.shape == ref.shape, (out_f32.shape, ref.shape)
    assert jnp.allclose(out_f32, ref, atol=1e-4, rtol=1e-4), "f32 mismatch"

    # 2) Default fast path: bf16 compute, full-K (single-K kernel), jitted to
    #    exercise the traced (static upper-bound) bookkeeping.
    w_bf16, b_r = prepare_params(weight, bias)          # bf16 weights
    fast_fn = jax.jit(lambda x_, gi_, w_, b_: deep_gemm_grouped_linear(
        x_, gi_, w_, b_, block_m=16, block_n=128))
    out_bf16 = jax.block_until_ready(fast_fn(x, group_indices, w_bf16, b_r))
    assert out_bf16.shape == ref.shape, (out_bf16.shape, ref.shape)
    assert jnp.allclose(out_bf16, ref, atol=1e-2, rtol=5e-2), "bf16 mismatch"

    print("KERNEL_OK")
</pallas_src>

<mosaic_0001>
module attributes {stable_mosaic.version = 11 : i64} {
  func.func @kernel(%arg0: i32, %arg1: i32, %arg2: i32, %arg3: memref<4xi32, #tpu.memory_space<smem>>, %arg4: memref<16x128xf32, #tpu.memory_space<vmem>>, %arg5: memref<1x128x128xf32, #tpu.memory_space<vmem>>, %arg6: memref<1x1x128xf32, #tpu.memory_space<vmem>>, %arg7: memref<16x128xf32, #tpu.memory_space<vmem>>, %arg8: memref<16x128xf32, #tpu.memory_space<vmem>>) attributes {dimension_semantics = [#tpu.dimension_semantics<parallel>, #tpu.dimension_semantics<arbitrary>, #tpu.dimension_semantics<arbitrary>], iteration_bounds = array<i64: 2, 4, 2>, scalar_prefetch = 1 : i64, scratch_operands = 1 : i64, tpu.core_type = #tpu.core_type<tc>, window_params = [{transform_indices = @transform_0, window_bounds = array<i64: 16, 128>}, {transform_indices = @transform_1, window_bounds = array<i64: 1, 128, 128>}, {transform_indices = @transform_2, window_bounds = array<i64: 1, 1, 128>}, {transform_indices = @transform_3, window_bounds = array<i64: 16, 128>}]} {
    %c0_i32 = arith.constant 0 : i32
    %0 = arith.cmpi eq, %arg2, %c0_i32 : i32
    %1 = arith.extui %0 : i1 to i32
    %c0_i32_0 = arith.constant 0 : i32
    %2 = arith.cmpi ne, %1, %c0_i32_0 : i32
    scf.if %2 {
      %cst_10 = arith.constant 0.000000e+00 : f32
      %13 = vector.broadcast %cst_10 : f32 to vector<16x128xf32>
      %c0_11 = arith.constant 0 : index
      %c0_12 = arith.constant 0 : index
      %14 = vector.load %arg8[%c0_11, %c0_12] : memref<16x128xf32, #tpu.memory_space<vmem>>, vector<16x128xf32>
      tpu.vector_store %arg8[%c0_11, %c0_12], %13 {strides = array<i32>} : memref<16x128xf32, #tpu.memory_space<vmem>>, vector<16x128xf32>,
    } else {
    }
    %c0 = arith.constant 0 : index
    %c0_1 = arith.constant 0 : index
    %3 = vector.load %arg8[%c0, %c0_1] : memref<16x128xf32, #tpu.memory_space<vmem>>, vector<16x128xf32>
    %c0_2 = arith.constant 0 : index
    %c0_3 = arith.constant 0 : index
    %4 = vector.load %arg4[%c0_2, %c0_3] : memref<16x128xf32, #tpu.memory_space<vmem>>, vector<16x128xf32>
    %c0_4 = arith.constant 0 : index
    %c0_5 = arith.constant 0 : index
    %c0_6 = arith.constant 0 : index
    %5 = vector.load %arg5[%c0_4, %c0_5, %c0_6] : memref<1x128x128xf32, #tpu.memory_space<vmem>>, vector<1x128x128xf32>
    %6 = vector.shape_cast %5 : vector<1x128x128xf32> to vector<128x128xf32>
    %cst = arith.constant dense<0.000000e+00> : vector<16x128xf32>
    %7 = tpu.matmul %4, %6, %cst {dimension_numbers = #tpu.dot_dimension_numbers<[1], [0], [0], [1], [0, 0, 1, 1], [], []>} : vector<16x128xf32>, vector<128x128xf32>, vector<16x128xf32> -> vector<16x128xf32>
    %8 = arith.addf %3, %7 : vector<16x128xf32>
    %c0_7 = arith.constant 0 : index
    %c0_8 = arith.constant 0 : index
    %9 = vector.load %arg8[%c0_7, %c0_8] : memref<16x128xf32, #tpu.memory_space<vmem>>, vector<16x128xf32>
    tpu.vector_store %arg8[%c0_7, %c0_8], %8 {strides = array<i32>} : memref<16x128xf32, #tpu.memory_space<vmem>>, vector<16x128xf32>,
    %c1_i32 = arith.constant 1 : i32
    %10 = arith.cmpi eq, %arg2, %c1_i32 : i32
    %11 = arith.extui %10 : i1 to i32
    %c0_i32_9 = arith.constant 0 : i32
    %12 = arith.cmpi ne, %11, %c0_i32_9 : i32
    scf.if %12 {
      %c0_10 = arith.constant 0 : index
      %c0_11 = arith.constant 0 : index
      %13 = vector.load %arg8[%c0_10, %c0_11] : memref<16x128xf32, #tpu.memory_space<vmem>>, vector<16x128xf32>
      %c0_12 = arith.constant 0 : index
      %c0_13 = arith.constant 0 : index
      %c0_14 = arith.constant 0 : index
      %14 = vector.load %arg6[%c0_12, %c0_13, %c0_14] : memref<1x1x128xf32, #tpu.memory_space<vmem>>, vector<1x1x128xf32>
      %15 = vector.shape_cast %14 : vector<1x1x128xf32> to vector<1x128xf32>
      %16 = vector.broadcast %15 : vector<1x128xf32> to vector<16x128xf32>
      %17 = arith.addf %13, %16 : vector<16x128xf32>
      %c0_15 = arith.constant 0 : index
      %c0_16 = arith.constant 0 : index
      %18 = vector.load %arg7[%c0_15, %c0_16] : memref<16x128xf32, #tpu.memory_space<vmem>>, vector<16x128xf32>
      tpu.vector_store %arg7[%c0_15, %c0_16], %17 {strides = array<i32>} : memref<16x128xf32, #tpu.memory_space<vmem>>, vector<16x128xf32>,
    } else {
    }
    return
  }
  func.func @transform_0(%arg0: i32, %arg1: i32, %arg2: i32, %arg3: memref<4xi32, #tpu.memory_space<smem>>) -> (i32, i32) {
    %c0_i32 = arith.constant 0 : i32
    return %arg1, %arg2 : i32, i32
  }
  func.func @transform_1(%arg0: i32, %arg1: i32, %arg2: i32, %arg3: memref<4xi32, #tpu.memory_space<smem>>) -> (i32, i32, i32) {
    %0 = arith.index_cast %arg1 : i32 to index
    %1 = memref.load %arg3[%0] : memref<4xi32, #tpu.memory_space<smem>>
    %c0_i32 = arith.constant 0 : i32
    return %1, %arg2, %arg0 : i32, i32, i32
  }
  func.func @transform_2(%arg0: i32, %arg1: i32, %arg2: i32, %arg3: memref<4xi32, #tpu.memory_space<smem>>) -> (i32, i32, i32) {
    %0 = arith.index_cast %arg1 : i32 to index
    %1 = memref.load %arg3[%0] : memref<4xi32, #tpu.memory_space<smem>>
    %c0_i32 = arith.constant 0 : i32
    %c0_i32_0 = arith.constant 0 : i32
    return %1, %c0_i32, %arg0 : i32, i32, i32
  }
  func.func @transform_3(%arg0: i32, %arg1: i32, %arg2: i32, %arg3: memref<4xi32, #tpu.memory_space<smem>>) -> (i32, i32) {
    %c0_i32 = arith.constant 0 : i32
    return %arg1, %arg0 : i32, i32
  }
}

</mosaic_0001>

<bundles_post_ra>
// kernel: tpu_custom_call.1
= control target key start
LH: loop header
LB: loop body
LE: loop exit
PB: predicated region body
PF: predicated region fallthrough
CT: control target
= control target key end

     0   :  { %s1593_s0 = inlined_call_operand.hbm [shape: s32[4], index: 0, kind: input, shape index: {}]   ;;  %s1594_s1 = inlined_call_operand.hbm [shape: f32[64,256], index: 1, kind: input, shape index: {}]   ;;  %s1595_s2 = inlined_call_operand.hbm [shape: f32[4,256,256], index: 2, kind: input, shape index: {}]   ;;  %s1596_s3 = inlined_call_operand.vmem [shape: f32[4,1,256], index: 3, kind: input, shape index: {}]   ;;  %s1597_s4 = inlined_call_operand.hbm [shape: f32[64,256], index: 4, kind: output, shape index: {}]  }
   0x1   :  { %1621 = sst [smem:[#allocation31_spill]] %s1594_s1  ;;  %s857_s17 = scalar_lea.hbm %s1593_s0, 16 }
   0x2   :  { %1622 = sst [smem:[#allocation32_spill]] %s1595_s2  ;;  %p858_p0 = scmp.ne.s32.totalorder %s1593_s0, %s857_s17 }
   0x3   :  { %1623 = sst [smem:[#allocation33_spill]] %s1596_s3  ;;  %p861_p1 = scmp.lt.u32.totalorder %s857_s17, %s1593_s0 }
   0x4   :  { %1624 = sst [smem:[#allocation34_spill]] %s1597_s4 }
   0x5   :  { %p863_p2 = pnand %p861_p1, %p858_p0 }
   0x7   :  { %866 = shalt.err (!%p863_p2)  }
   0x8   :  { %s1097_s22 = smov [#allocation4]  }
   0x9   :  { %10 = dma.hbm_to_smem %s1593_s0, 16, %s1097_s22, [#allocation3] }
   0xa   :  { %1019 = dma.done.wait [#allocation3], 16 }
   0xb   :  { %1020 = vsyncadd [#allocation3], 4294967280 }
   0xc   :  { %12 = sfence }
   0xd   :  { %13 = vsyncpa [#allocation6], 0 }
   0xe   :  { %15 = vsyncpa [#allocation6 + $0x1], 0 }
   0xf   :  { %16 = vsyncpa [#allocation9], 0 }
  0x10   :  { %18 = vsyncpa [#allocation9 + $0x1], 0 }
  0x11   :  { %19 = vsyncpa [#allocation7], 0 }
  0x12   :  { %21 = vsyncpa [#allocation7 + $0x1], 0  ;;  %s1145_s25 = smov 0   ;;  %s1147_s26 = smov 0  }
  0x13   :  { %s1149_s27 = smov 0   ;;  %s1151_s28 = smov 0  }
  0x14   :  { %s1153_s29 = smov 0   ;;  %s1155_s0 = smov 0  }
  0x15   :  { %s1157_s30 = smov 0   ;;  %s1159_s5 = smov 0  }
  0x16   :  { %s1161_s6 = smov 0   ;;  %s1163_s7 = smov 0  }
  0x17   :  { %s1165_s8 = smov 0   ;;  %s1167_s9 = smov 0  }
  0x18   :  { %s1169_s10 = smov 0   ;;  %s1171_s11 = smov 0  }
  0x19   :  { %s1173_s12 = smov 0   ;;  %s1175_s13 = smov 0  }
  0x1a LB: > { %1625 = sst [smem:[#allocation17_spill]] %s1035_s25  ;;  %s583_s14 = sadd.s32 4294967295, %s1095_s13   ;;  %s1095_s13 = sphi %s1175_s13, %s27_s13   ;;  %s1091_s12 = sphi %s1173_s12, %s1703_s12   ;;  %s1087_s11 = sphi %s1171_s11, %s1690_s11   ;;  %s1083_s10 = sphi %s1169_s10, %s1702_s10   ;;  %s1079_s9 = sphi %s1167_s9, %s1701_s9   ;;  %s1075_s8 = sphi %s1165_s8, %s1688_s8   ;;  %s1071_s7 = sphi %s1163_s7, %s1700_s7   ;;  %s1067_s6 = sphi %s1161_s6, %s1699_s6   ;;  %s1063_s5 = sphi %s1159_s5, %s1698_s5   ;;  %s1059_s30 = sphi %s1157_s30, %s1686_s30   ;;  %s1055_s0 = sphi %s1155_s0, %s1697_s0   ;;  %s1051_s29 = sphi %s1153_s29, %s1696_s29   ;;  %s1047_s28 = sphi %s1151_s28, %s1695_s28   ;;  %s1043_s27 = sphi %s1149_s27, %s1694_s27   ;;  %s1039_s26 = sphi %s1147_s26, %s1693_s26   ;;  %s1035_s25 = sphi %s1145_s25, %s1692_s25  }
  0x1b   : > { %1626 = sst [smem:[#allocation18_spill]] %s1039_s26  ;;  %s39_s15 = sadd.s32 1, %s1083_s10 }
  0x1c   : > { %1627 = sst [smem:[#allocation19_spill]] %s1063_s5  ;;  %p40_p3 = scmp.ge.s32.totalorder %s39_s15, 2 }
  0x1d   : > { %1628 = sst [smem:[#allocation20_spill]] %s1071_s7  ;;  %s42_s16 = sadd.s32 1, %s1087_s11 }
  0x1e   : > { %1629 = sst [smem:[#allocation21_spill]] %s1075_s8  ;;  %s55_s17 = sadd.s32 1, %s1067_s6 }
  0x1f   : > { %1630 = sst [smem:[#allocation22_spill]] %s1079_s9  ;;  %p62_p4 = scmp.ne.s32.totalorder %s1067_s6, %s1063_s5 }
  0x20   : > { %1631 = sst [smem:[#allocation23_spill]] %s1087_s11  ;;  %s1705_s15 = smov (%p40_p3, %s39_s15), 0 }
  0x21   : > { %1632 = sst [smem:[#allocation24_spill]] %s1705_s15  ;;  %s1707_s16 = smov (!%p40_p3, %s42_s16), %s1087_s11 }
  0x22   : > { %s51_s18 = ssub.s32 %s1083_s10, %s1705_s15  ;;  %p1611_p5 = scmp.eq.s32.totalorder %s1095_s13, 0 }
  0x23   : > { %p1612_p6 = scmp.ge.s32.totalorder %s1707_s16, 4  ;;  %p68_p7 = scmp.ne.s32.totalorder %s1063_s5, %s1059_s30 }
  0x24   : > { %p1241_p8 = por %p1611_p5, %p62_p4  ;;  %p1245_p9 = scmp.eq.s32.totalorder %s583_s14, 0 }
  0x25   : > { %s1252_s21 = scalar_select %p1612_p6, 0, %s1707_s16  }
  0x26   : > { %p1256_p10 = por %p1245_p9, %p68_p7  ;;  %s78_s23 = sld [smem:[#allocation4 + %s1087_s11]] }
  0x27   : > { %1635 = sst [smem:[#allocation25_spill]] %s1252_s21  ;;  %s1263_s24 = ssub.s32 %s1087_s11, %s1252_s21 }
  0x28   : > { %s1636_s22 = scalar_select %p1256_p10, 1, 0 }
  0x29   : > { %1638 = sst [smem:[#allocation27_spill]] %s1263_s24  ;;  %s52_s15 = sor.u32 %s51_s18, %s1263_s24 }
  0x2a   : > { %1637 = sst [smem:[#allocation26_spill]] %s1636_s22  ;;  %p1267_p11 = scmp.eq.s32.totalorder %s583_s14, 15 }
  0x2b   : > { %s79_s30 = sld [smem:[#allocation4 + %s1252_s21]]  ;;  %p53_p12 = scmp.eq.s32.totalorder %s52_s15, 0 }
  0x2c   : > { %s1639_s4 = scalar_select %p1267_p11, 1, 0 }
  0x2d   : > { %p1610_p13 = scmp.lt.s32.totalorder %s1095_s13, 16  ;;  %s182_s7 = sand.u32 1, %s1067_s6  }
  0x2e   : > { %1640 = sst [smem:[#allocation28_spill]] %s1639_s4  ;;  %s587_s9 = sshll.u32 %s182_s7, 4 }
  0x2f   : > { %s1274_s3 = scalar_select %p53_p12, %s1067_s6, %s55_s17  }
  0x30   : > { %s610_s5 = sshll.u32 %s1087_s11, 2  ;;  %s186_s25 = scalar_lea.vmem [#allocation5], %s587_s9 }
  0x31   : > { %1641 = sst [smem:[#allocation29_spill]] %s1274_s3  ;;  %s80_s8 = ssub.s32 %s78_s23, %s79_s30 }
  0x32   : > { %s1276_s22 = sor.u32 %s80_s8, %s51_s18  ;;  %s192_s2 = sadd.s32 %s1083_s10, %s610_s5 }
  0x33   : > { %s195_s21 = sshll.u32 %s186_s25, 4  ;;  %s590_s24 = sshll.u32 %s192_s2, 7  ;;  %s1280_s21 = int_to_ptr.vmem [resolvable:$true] %s195_s21 }
  0x34   : > { %s1642_s1 = sld [smem:[#allocation31_spill]]  ;;  %p1291_p0 = pnand %p1610_p13, %p1241_p8 }
  0x35   : > { %s1295_s2 = scalar_lea.sflag [#allocation6], %s182_s7 }
  0x36   : > { %p869_p2 = pneg %p1291_p0 }
  0x3a   : > { %s1285_s4 = scalar_lea.hbm %s1642_s1, %s590_s24  ;;  %s872_s9 = scalar_lea.hbm %s1642_s1, 2048 }
  0x3b   : > { %s867_s25 = scalar_lea.hbm %s1285_s4, 256  ;;  %p873_p7 = scmp.lt.u32.totalorder %s1285_s4, %s1642_s1 }
  0x3c   : > { %p868_p1 = scmp.ne.s32.totalorder %s1285_s4, %s867_s25  ;;  %p874_p8 = scmp.lt.u32.totalorder %s872_s9, %s867_s25 }
  0x3d   : > { %p876_p13 = scmp.lt.u32.totalorder %s867_s25, %s1285_s4 }
  0x3e   : > { %p870_p3 = pnand %p869_p2, %p868_p1  ;;  %p875_p12 = por %p874_p8, %p873_p7 }
  0x40   : > { %p871_p4 = pneg %p870_p3  ;;  %p877_p5 = por %p876_p13, %p875_p12 }
  0x42   : > { %p878_p6 = pnand %p877_p5, %p871_p4 }
  0x44   : > { %881 = shalt.err (!%p878_p6)
}
  0x45   : > { %s882_s7 = scalar_lea.vmem %s1280_s21, 256  ;;  %s1098_s18 = smov [#allocation5]  }
  0x46   : > { %p883_p1 = scmp.ne.s32.totalorder %s1280_s21, %s882_s7  ;;  %s887_s19 = sshll.u32 %s1098_s18, 4  ;;  %s888_s19 = int_to_ptr.vmem [resolvable:$false] %s887_s19 }
  0x47   : > { %s889_s23 = scalar_lea.vmem %s888_s19, 512  ;;  %p890_p11 = scmp.lt.s32.totalorder %s1280_s21, %s888_s19 }
  0x48   : > { %p885_p3 = pnand %p883_p1, %p869_p2  ;;  %p891_p7 = scmp.lt.s32.totalorder %s889_s23, %s882_s7 }
  0x4a   : > { %p886_p10 = pneg %p885_p3  ;;  %p892_p8 = por %p891_p7, %p890_p11 }
  0x4c   : > { %p893_p13 = pnand %p892_p8, %p886_p10 }
  0x4e   : > { %896 = shalt.err (!%p893_p13)
}
  0x4f   : > { %s1614_s24 = smov 256   ;;  %s1615_s30 = smov 128  }
  0x50   : > { %s1616_s14 = smov 8   ;;  %s1644_s25 = sld [smem:[#allocation18_spill]] }
  0x51   : > { %709 = dma.hbm_to_vmem [thread:$0]  (!%p1291_p0), %s1285_s4, 256, %s1280_s21, %s1295_s2, %s1614_s24, %s1615_s30, %s1616_s14  }
  0x52   : > { %s1645_s26 = sld [smem:[#allocation17_spill]]  ;;  %p596_p5 = scmp.ge.s32.totalorder %s1095_s13, 1 }
  0x53   : > { %p241_p6 = scmp.lt.s32.totalorder %s1095_s13, 17  ;;  %s584_s9 = sadd.s32 4294967294, %s1095_s13  }
  0x54   : > { %s1647_s15 = sld [smem:[#allocation27_spill]]  ;;  %s46_s17 = sadd.s32 1, %s1091_s12 }
  0x55   : > { %p1328_p10 = pnand %p596_p5, %p241_p6  ;;  %s87_s8 = sadd.s32 1, %s1055_s0 }
  0x56   : > { %p1648_p11 = scmp.ge.s32.totalorder %s1707_s16, 4  ;;  %s1649_s7 = sld [smem:[#allocation28_spill]] }
  0x57   : > { %p94_p2 = scmp.ne.s32.totalorder %s1055_s0, %s1051_s29  ;;  %p100_p4 = scmp.ne.s32.totalorder %s1051_s29, %s1047_s28 }
  0x58   : > { %s1709_s17 = smov (!%p1648_p11, %s46_s17), %s1091_s12  ;;  %s145_s4 = sadd.s32 1, %s1043_s27 }
  0x59   : > { %p48_p0 = scmp.ge.s32.totalorder %s1709_s17, 2  ;;  %p1650_p12 = scmp.eq.s32.totalorder %s1095_s13, 0 }
  0x5a   : > { %p1351_p3 = por %p100_p4, %p1245_p9  ;;  %p155_p7 = scmp.ne.s32.totalorder %s1043_s27, %s1644_s25 }
  0x5b   : > { %p1345_p1 = por %p94_p2, %p1650_p12  ;;  %s1711_s17 = smov (%p48_p0, %s1709_s17), 0 }
  0x5c   : > { %s1652_s2 = scalar_select %p1351_p3, 1, 0 }
  0x5d   : > { %1653 = sst [smem:[#allocation30_spill]] %s1711_s17  ;;  %p161_p8 = scmp.ne.s32.totalorder %s1644_s25, %s1645_s26 }
  0x5e   : > { %s83_s28 = ssub.s32 %s1091_s12, %s1711_s17  ;;  %p162_p13 = scmp.eq.s32.totalorder %s584_s9, 15 }
  0x5f   : > { %s84_s16 = sor.u32 %s83_s28, %s1276_s22  ;;  %s142_s20 = sor.u32 %s83_s28, %s1647_s15 }
  0x60   : > { %p85_p9 = scmp.eq.s32.totalorder %s84_s16, 0  ;;  %p143_p5 = scmp.eq.s32.totalorder %s142_s20, 0 }
  0x61   : > { %p1654_p6 = scmp.ne.s32.totalorder %s1649_s7, 0  ;;  %p1371_p2 = por %p162_p13, %p161_p8 }
  0x62   : > { %s1376_s23 = scalar_select %p85_p9, %s1055_s0, %s87_s8  }
  0x63   : > { %p1367_p11 = por %p1654_p6, %p155_p7  ;;  %s205_s26 = sand.u32 1, %s1055_s0  }
  0x64   : > { %s1656_s19 = scalar_select %p1371_p2, 1, 0 }
  0x65   : > { %s1655_s18 = scalar_select %p1367_p11, 1, 0 }
  0x66   : > { %s1379_s25 = scalar_select %p143_p5, %s1043_s27, %s145_s4  }
  0x67   : > { %s591_s22 = sshll.u32 %s205_s26, 7  ;;  %p1657_p4 = scmp.lt.s32.totalorder %s1095_s13, 16 }
  0x68   : > { %s699_s9 = scalar_select %p1345_p1, [#allocation4], [#allocation11] }
  0x69   : > { %s700_s15 = scalar_select %p1345_p1, %s1087_s11, 0 }
  0x6a   : > { %s1713_s9 = smov (!%p1657_p4, %s699_s9), [#allocation12]  ;;  %p1658_p0 = pmov %p1657_p4 }
  0x6b   : > { %s611_s4 = sshll.u32 %s1083_s10, 5  ;;  %s209_s16 = scalar_lea.vmem [#allocation8], %s591_s22 }
  0x6c   : > { %s1715_s15 = smov (!%p1658_p0, %s700_s15), 0  ;;  %p1659_p12 = pmov %p1658_p0 }
  0x6d   : > { %s210_s8 = sld [smem:[%s1713_s9 + %s1715_s15]]  ;;  %s216_s28 = sadd.s32 %s1091_s12, %s611_s4 }
  0x6e   : > { %p1395_p7 = pnand %p1659_p12, %p1345_p1  ;;  %s221_s20 = sshll.u32 %s209_s16, 4  ;;  %s1401_s20 = int_to_ptr.vmem [resolvable:$true] %s221_s20 }
  0x6f   : > { %s1661_s21 = sld [smem:[#allocation32_spill]]  ;;  %s1408_s3 = scalar_lea.sflag [#allocation9], %s205_s26 }
  0x70   : > { %p899_p8 = pneg %p1395_p7 }
  0x73   : > { %s594_s24 = sshll.u32 %s210_s8, 6 }
  0x74   : > { %s218_s30 = sadd.s32 %s594_s24, %s216_s28 }
  0x75   : > { %s595_s14 = sshll.u32 %s218_s30, 7  ;;  %s902_s1 = scalar_lea.hbm %s1661_s21, 32768 }
  0x76   : > { %s1406_s11 = scalar_lea.hbm %s1661_s21, %s595_s14 }
  0x77   : > { %s897_s9 = scalar_lea.hbm %s1406_s11, 2048  ;;  %p903_p5 = scmp.lt.u32.totalorder %s1406_s11, %s1661_s21 }
  0x78   : > { %p898_p1 = scmp.ne.s32.totalorder %s1406_s11, %s897_s9  ;;  %p904_p6 = scmp.lt.u32.totalorder %s902_s1, %s897_s9 }
  0x79   : > { %p906_p0 = scmp.lt.u32.totalorder %s897_s9, %s1406_s11 }
  0x7a   : > { %p900_p13 = pnand %p899_p8, %p898_p1  ;;  %p905_p4 = por %p904_p6, %p903_p5 }
  0x7c   : > { %p901_p9 = pneg %p900_p13  ;;  %p907_p12 = por %p906_p0, %p905_p4 }
  0x7e   : > { %p908_p2 = pnand %p907_p12, %p901_p9 }
  0x80   : > { %911 = shalt.err (!%p908_p2)
}
  0x81   : > { %s912_s26 = scalar_lea.vmem %s1401_s20, 2048  ;;  %s1102_s22 = smov [#allocation8]  }
  0x82   : > { %p913_p1 = scmp.ne.s32.totalorder %s1401_s20, %s912_s26  ;;  %s917_s15 = sshll.u32 %s1102_s22, 4  ;;  %s918_s15 = int_to_ptr.vmem [resolvable:$false] %s917_s15 }
  0x83   : > { %s919_s8 = scalar_lea.vmem %s918_s15, 4096  ;;  %p920_p3 = scmp.lt.s32.totalorder %s1401_s20, %s918_s15 }
  0x84   : > { %p915_p13 = pnand %p913_p1, %p899_p8  ;;  %p921_p5 = scmp.lt.s32.totalorder %s919_s8, %s912_s26 }
  0x86   : > { %p916_p11 = pneg %p915_p13  ;;  %p922_p6 = por %p921_p5, %p920_p3 }
  0x88   : > { %p923_p4 = pnand %p922_p6, %p916_p11 }
  0x8a   : > { %926 = shalt.err (!%p923_p4)
}
  0x8b   : > { %s1662_s4 = smov 8   ;;  %s1663_s28 = smov 128  }
  0x8c   : > { %s1664_s16 = smov 256   ;;  %245 = sbr.rel (%p1328_p10) target bundleno = 465 (0x1d1), region = 32 }
  0x8d   : > { %714 = dma.hbm_to_vmem [thread:$0]  (!%p1395_p7), %s1406_s11, 2048, %s1401_s20, %s1408_s3, %s1664_s16, %s1663_s28, %s1662_s4  }
  0x8e   : > { %s1665_s9 = sld [smem:[#allocation19_spill]] (!%p1328_p10)  ;;  %s1666_s24 = sld [smem:[#allocation26_spill]] (!%p1328_p10) }
  0x94   : > { %s247_s30 = sand.u32 1, %s1665_s9   ;;  %p1667_p3 = scmp.ne.s32.totalorder %s1666_s24, 0 }
  0x95   : > { %s1442_s1 = sshll.u32 %s247_s30, 4  ;;  %s248_s14 = scalar_lea.sflag [#allocation6], %s247_s30 }
  0x96   : > { %s251_s17 = scalar_lea.vmem [#allocation5], %s1442_s1 }
  0x97   : > { %1022 = dma.done.wait (%p1667_p3), %s248_s14, 256  }
  0x98   : > { %1024 = vsyncadd (%p1667_p3), %s248_s14, 4294967040  ;;  %s256_s7 = sand.u32 1, %s1051_s29   ;;  %p1668_p10 = scmp.ne.s32.totalorder %s1652_s2, 0 }
  0x99   : > { %s598_s3 = sshll.u32 %s256_s7, 7  ;;  %s257_s11 = scalar_lea.sflag [#allocation9], %s256_s7 }
  0x9a   : > { %s1450_s5 = scalar_lea.vmem [#allocation8], %s598_s3 }
  0x9b   : > { %1026 = dma.done.wait (%p1668_p10), %s257_s11, 2048  }
  0x9c   : > { %1028 = vsyncadd (%p1668_p10), %s257_s11, 4294965248  ;;  %s1669_s20 = sld [smem:[#allocation18_spill]]  ;;  %s1670_s26 = sld [smem:[#allocation21_spill]] }
  0x9d   : > { %s1671_s22 = sld [smem:[#allocation22_spill]]  ;;  %s1672_s24 = sld [smem:[#allocation33_spill]] }
  0x9e   : > { %s1673_s7 = sld [smem:[#allocation20_spill]] }
  0xa2   : > { %s293_s15 = sand.u32 1, %s1669_s20   ;;  %s299_s8 = sld [smem:[#allocation4 + %s1670_s26]] }
  0xa3   : > { %s599_s4 = sshll.u32 %s293_s15, 4  ;;  %p302_p11 = scmp.lt.s32.totalorder %s1671_s22, 1 }
  0xa4   : > { %s1468_s14 = scalar_lea.vmem [#allocation10], %s599_s4  ;;  %p601_p7 = scmp.ne.s32.totalorder %s1673_s7, 0 }
  0xa5   : > { %s1717_s22 = smov (!%p302_p11, %s1671_s22), 1  ;;  %v1103_v0 = vmov (!%p601_p7), 0.0  }
  0xa6   : > { %313 = vst [vmem:[#allocation2] sm:$0xff] (!%p601_p7), %v1103_v0  ;;  %314 = vst [vmem:[#allocation2 + $0x8] sm:$0xff] (!%p601_p7), %v1103_v0 }
  0xa7   : > { %312 = sbr.rel (%p601_p7) target bundleno = 174 (0xae), region = 44 }
  0xa8   : > { %p300_p2 = scmp.lt.s32.totalorder %s299_s8, 3 }
  0xaa   : > { %s1719_s8 = smov (!%p300_p2, %s299_s8), 3 }
  0xab   : > { %s600_s28 = sshll.u32 %s1719_s8, 1 }
  0xac   : > { %s1462_s16 = sadd.s32 %s600_s28, %s1717_s22 }
  0xad   : > { %s306_s30 = scalar_lea.vmem %s1672_s24, %s1462_s16 }
  0xae PF: > { %v319_v1 = vld [vmem:[%s1450_s5] sm:$0xff]  ;;  %v320_v2 = vld [vmem:[%s1450_s5 + $0x8] sm:$0xff]  ;;  %v321_v3 = vld [vmem:[%s1450_s5 + $0x10] sm:$0xff]  ;;  %s1674_s3 = sld [smem:[#allocation20_spill]] }
  0xaf   : > { %v666_v4 = vpack.c.bf16 %v320_v2, %v319_v1  ;;  %v322_v5 = vld [vmem:[%s1450_s5 + $0x18] sm:$0xff]  ;;  %v323_v7 = vld [vmem:[%s1450_s5 + $0x20] sm:$0xff]  ;;  %v324_v8 = vld [vmem:[%s1450_s5 + $0x28] sm:$0xff] }
  0xb0   : > { %v670_v6 = vpack.c.bf16 %v322_v5, %v321_v3  ;;  %v674_v9 = vpack.c.bf16 %v324_v8, %v323_v7  ;;  %v317_v10 = vld [vmem:[%s251_s17] sm:$0xff]  ;;  %v326_v12 = vld [vmem:[%s1450_s5 + $0x38] sm:$0xff]  ;;  %v328_v15 = vld [vmem:[%s1450_s5 + $0x48] sm:$0xff] }
  0xb1   : > { %667 = vmatprep.subr.bf16.mxu0 %v666_v4  ;;  %v325_v11 = vld [vmem:[%s1450_s5 + $0x30] sm:$0xff]  ;;  %663 = vmatprep.mubr.f32.mxu0 %v317_v10  ;;  %v327_v14 = vld [vmem:[%s1450_s5 + $0x40] sm:$0xff]  ;;  %v330_v18 = vld [vmem:[%s1450_s5 + $0x58] sm:$0xff] }
  0xb2   : > { %669 = vmatpush3.bf16.msra.mxu0 %v666_v4  ;;  %v678_v13 = vpack.c.bf16 %v326_v12, %v325_v11  ;;  %v682_v16 = vpack.c.bf16 %v328_v15, %v327_v14  ;;  %v329_v17 = vld [vmem:[%s1450_s5 + $0x50] sm:$0xff]  ;;  %v331_v20 = vld [vmem:[%s1450_s5 + $0x60] sm:$0xff]  ;;  %v332_v21 = vld [vmem:[%s1450_s5 + $0x68] sm:$0xff] }
  0xb3   : > { %671 = vmatprep.subr.bf16.mxu0 %v670_v6  ;;  %v686_v19 = vpack.c.bf16 %v330_v18, %v329_v17  ;;  %v690_v22 = vpack.c.bf16 %v332_v21, %v331_v20  ;;  %v333_v23 = vld [vmem:[%s1450_s5 + $0x70] sm:$0xff]  ;;  %v334_v24 = vld [vmem:[%s1450_s5 + $0x78] sm:$0xff] }
  0xb4   : > { %v694_v25 = vpack.c.bf16 %v334_v24, %v333_v23  ;;  %v318_v26 = vld [vmem:[%s251_s17 + $0x8] sm:$0xff]  ;;  %v315_v28 = vld [vmem:[#allocation2] sm:$0xff]  ;;  %p602_p8 = scmp.ne.s32.totalorder %s1674_s3, 1 }
  0xb5   : > { %v316_v27 = vld [vmem:[#allocation2 + $0x8] sm:$0xff]  ;;  %v603_v34 = vld [vmem:[%s306_s30] ss:$0 sm:$0xff] (!%p602_p8) }
  0xb6   : > { %673 = vmatpush3.bf16.msra.mxu0 %v670_v6 }
  0xb7   : > { %675 = vmatprep.subr.bf16.mxu0 %v674_v9 }
  0xba   : > { %677 = vmatpush3.bf16.msra.mxu0 %v674_v9 }
  0xbb   : > { %679 = vmatprep.subr.bf16.mxu0 %v678_v13 }
  0xbe   : > { %681 = vmatpush3.bf16.msra.mxu0 %v678_v13 }
  0xbf   : > { %683 = vmatprep.subr.bf16.mxu0 %v682_v16 }
  0xc2   : > { %685 = vmatpush3.bf16.msra.mxu0 %v682_v16 }
  0xc3   : > { %687 = vmatprep.subr.bf16.mxu0 %v686_v19 }
  0xc6   : > { %689 = vmatpush3.bf16.msra.mxu0 %v686_v19 }
  0xc7   : > { %691 = vmatprep.subr.bf16.mxu0 %v690_v22 }
  0xca   : > { %693 = vmatpush3.bf16.msra.mxu0 %v690_v22 }
  0xcb   : > { %695 = vmatprep.subr.bf16.mxu0 %v694_v25 }
  0xce   : > { %697 = vmatpush3.bf16.msra.mxu0 %v694_v25 }
  0xd1   : > { %664 = vmatmul.mubr.f32.vlgmr.msra.gmra.mrb[0].mxu0 %v318_v26 }
 0x1a2   : > { %417 = sbr.rel (%p602_p8) target bundleno = 435 (0x1b3), region = 48 }
 0x1a4   : > { %v665_v29 = vpop.f32.mrb[0].mxu0 }
 0x1a5   : > { %v411_v30 = vadd.f32 %v665_v29, %v316_v27  ;;  %v401_v31 = vpop.f32.mrb[1].mxu0 }
 0x1a6   : > { %v410_v32 = vadd.f32 %v401_v31, %v315_v28 }
 0x1a7   : > { %413 = vst [vmem:[#allocation2 + $0x8] sm:$0xff] %v411_v30 }
 0x1a8   : > { %412 = vst [vmem:[#allocation2] sm:$0xff] %v410_v32 }
 0x1ae   : > { %v419_v35 = vld [vmem:[#allocation2 + $0x8] sm:$0xff] }
 0x1af   : > { %v418_v33 = vld [vmem:[#allocation2] sm:$0xff]  ;;  %v428_v37 = vadd.f32 %v603_v34, %v419_v35 }
 0x1b0   : > { %v427_v36 = vadd.f32 %v603_v34, %v418_v33 }
 0x1b1   : > { %430 = vst [vmem:[%s1468_s14 + $0x8] sm:$0xff] %v428_v37 }
 0x1b2   : > { %429 = vst [vmem:[%s1468_s14] sm:$0xff] %v427_v36 }
 0x1b3 PF: > { %s1676_s1 = sld [smem:[#allocation21_spill]]  ;;  %s1677_s17 = sld [smem:[#allocation22_spill]] }
 0x1b4   : > { %s447_s4 = sshll.u32 %s1468_s14, 4  ;;  %s1679_s2 = sld [smem:[#allocation34_spill]]  ;;  %s1502_s4 = int_to_ptr.vmem [resolvable:$true] %s447_s4 }
 0x1b5   : > { %s1511_s30 = scalar_lea.sflag [#allocation7], %s293_s15  ;;  %s927_s7 = scalar_lea.vmem %s1502_s4, 256 }
 0x1b6   : > { %p928_p9 = scmp.ne.s32.totalorder %s1502_s4, %s927_s7  ;;  %p1680_p0 = scmp.ne.s32.totalorder %s1655_s18, 0 }
 0x1b7   : > { %s1104_s14 = smov [#allocation10]  }
 0x1b8   : > { %p929_p12 = pnand %p928_p9, %p1680_p0  ;;  %s931_s3 = sshll.u32 %s1104_s14, 4  ;;  %s932_s3 = int_to_ptr.vmem [resolvable:$false] %s931_s3 }
 0x1b9   : > { %s612_s22 = sshll.u32 %s1676_s1, 2  ;;  %s933_s11 = scalar_lea.vmem %s932_s3, 512 }
 0x1ba   : > { %s444_s8 = sadd.s32 %s1677_s17, %s612_s22  ;;  %p930_p1 = pneg %p929_p12 }
 0x1bb   : > { %s607_s28 = sshll.u32 %s444_s8, 7  ;;  %p934_p13 = scmp.lt.s32.totalorder %s1502_s4, %s932_s3 }
 0x1bc   : > { %s1507_s24 = scalar_lea.hbm %s1679_s2, %s607_s28  ;;  %p935_p5 = scmp.lt.s32.totalorder %s933_s11, %s927_s7 }
 0x1be   : > { %p936_p6 = por %p935_p5, %p934_p13 }
 0x1c0   : > { %p937_p4 = pnand %p936_p6, %p930_p1 }
 0x1c2   : > { %940 = shalt.err (!%p937_p4)
}
 0x1c3   : > { %s941_s15 = scalar_lea.hbm %s1507_s24, 256  ;;  %s945_s1 = scalar_lea.hbm %s1679_s2, 2048 }
 0x1c4   : > { %p942_p3 = scmp.ne.s32.totalorder %s1507_s24, %s941_s15  ;;  %p946_p2 = scmp.lt.u32.totalorder %s1507_s24, %s1679_s2 }
 0x1c5   : > { %p947_p7 = scmp.lt.u32.totalorder %s945_s1, %s941_s15  ;;  %p949_p9 = scmp.lt.u32.totalorder %s941_s15, %s1507_s24 }
 0x1c6   : > { %p943_p10 = pnand %p942_p3, %p1680_p0 }
 0x1c7   : > { %p948_p8 = por %p947_p7, %p946_p2 }
 0x1c8   : > { %p944_p11 = pneg %p943_p10 }
 0x1c9   : > { %p950_p12 = por %p949_p9, %p948_p8 }
 0x1cb   : > { %p951_p1 = pnand %p950_p12, %p944_p11 }
 0x1cd   : > { %954 = shalt.err (!%p951_p1)
}
 0x1ce   : > { %s1105_s22 = smov 128   ;;  %s1106_s8 = smov 256  }
 0x1cf   : > { %s1107_s28 = smov 8  }
 0x1d0   : > { %704 = dma.vmem_to_hbm [thread:$0]  (%p1680_p0), %s1502_s4, 256, %s1507_s24, %s1511_s30, %s1105_s22, %s1106_s8, %s1107_s28  }
 0x1d1 PF: > { %s1681_s16 = sld [smem:[#allocation17_spill]]  ;;  %p720_p13 = scmp.ge.s32.totalorder %s1095_s13, 2 }
 0x1d2   : > { %p1682_p5 = scmp.ne.s32.totalorder %s1656_s19, 0 }
 0x1d4   : > { %p716_p6 = pnand %p720_p13, %p1682_p5 }
 0x1d7   : > { %s462_s9 = sand.u32 1, %s1681_s16  }
 0x1d8   : > { %s463_s7 = scalar_lea.sflag [#allocation7], %s462_s9 }
 0x1d9   : > { %1030 = dma.done.wait (!%p716_p6), %s463_s7, 256  }
 0x1da   : > { %1032 = vsyncadd (!%p716_p6), %s463_s7, 4294967040  ;;  %s27_s13 = sadd.s32 1, %s1095_s13   ;;  %s1684_s3 = sld [smem:[#allocation18_spill]] }
 0x1db   : > { %p1540_p4 = scmp.ge.s32.totalorder %s27_s13, 18   ;;  %s1685_s18 = smov %s1379_s25 }
 0x1dc   : > { %s1686_s30 = sld [smem:[#allocation19_spill]]  ;;  %s1687_s4 = sld [smem:[#allocation29_spill]] }
 0x1dd   : > { %s1688_s8 = sld [smem:[#allocation23_spill]]  ;;  %s1689_s19 = sld [smem:[#allocation24_spill]] }
 0x1de   : > { %s1690_s11 = sld [smem:[#allocation25_spill]]  ;;  %s1691_s24 = sld [smem:[#allocation30_spill]] }
 0x1df   : > { %s1693_s26 = smov %s1043_s27  ;;  %s1694_s27 = smov %s1685_s18 }
 0x1e0   : > { %s1692_s25 = smov %s1684_s3  ;;  %s1695_s28 = smov %s1051_s29 }
 0x1e1   : > { %s1696_s29 = smov %s1055_s0  ;;  %s1697_s0 = smov %s1376_s23 }
 0x1e2   : > { %s1698_s5 = smov %s1067_s6  ;;  %s1699_s6 = smov %s1687_s4 }
 0x1e3   : > { %s1700_s7 = smov %s1083_s10  ;;  %s1701_s9 = smov %s1091_s12 }
 0x1e4   : > { %s1702_s10 = smov %s1689_s19  ;;  %s1703_s12 = smov %s1691_s24 }
 0x1e5   :  { %26 = sbr.rel (!%p1540_p4) target bundleno = 26 (0x1a), region = 101 }
 0x1ec   :  { %468 = vsyncpa [#allocation6], 1 }
 0x1ed   :  { %470 = vsyncpa [#allocation6 + $0x1], 1 }
 0x1ee   :  { %471 = vsyncpa [#allocation9], 1 }
 0x1ef   :  { %473 = vsyncpa [#allocation9 + $0x1], 1 }
 0x1f0   :  { %474 = vsyncpa [#allocation7], 1 }
 0x1f1   :  { %476 = vsyncpa [#allocation7 + $0x1], 1 }

</bundles_post_ra>
